<compile_context>
chip_gen: v6e
topology: v6e:2x2x1
jax: 0.10.0
libtpu: 0.0.40
codegen_flags: <defaults>
</compile_context>

<pallas_src>
import numpy as np

import jax
import jax.numpy as jnp
from jax.experimental import pallas as pl
from jax.experimental.pallas import tpu as pltpu


def encoder_block_kernel(xcat_ref, w1_ref, w2_ref, o_ref, pool_ref):
    # xcat_ref : (1, H, 3*(W+2)*Cin)   conv1 im2row patches (built in the wrapper)
    # w1_ref   : (3*(W+2)*Cin, W*Cmid) packed banded conv1 weight
    # w2_ref   : (3, W*Cmid, W*Cout)   packed banded conv2 weights (cols = [even-x | odd-x])
    # o_ref    : (1, H//2, (W//2)*Cout) pooled output (lane-dense rows)
    # pool_ref : (H, (W//2)*Cout) f32  scratch for the strided row-pair max
    H = xcat_ref.shape[1]
    WCmid = w1_ref.shape[1]
    WCout = w2_ref.shape[2]
    half = WCout // 2
    Ho = H // 2

    # ---- conv1 + relu1: single lane-dense MXU matmul, f32 accumulation ----
    mid = jnp.dot(xcat_ref[0], w1_ref[...], preferred_element_type=jnp.float32)
    mid = jnp.maximum(mid, 0.0)                          # (H, W*Cmid) ~ 2 vregs

    # ---- conv2 + relu2: y taps = zero-filled row shifts, x taps folded into weights ----
    zrow = jnp.zeros((1, WCmid), mid.dtype)
    row_m1 = jnp.concatenate([zrow, mid[:H - 1]], axis=0)   # mid[y-1] (zero row at y=0)
    row_p1 = jnp.concatenate([mid[1:], zrow], axis=0)       # mid[y+1] (zero row at y=H-1)
    pre = (jnp.dot(row_m1, w2_ref[0], preferred_element_type=jnp.float32)
           + jnp.dot(mid,   w2_ref[1], preferred_element_type=jnp.float32)
           + jnp.dot(row_p1, w2_ref[2], preferred_element_type=jnp.float32))
    act = jnp.maximum(pre, 0.0)                          # (H, W*Cout), lanes = [even-x | odd-x]

    # ---- fused 2x2 max-pool ----
    # x direction: lane-half max (free, thanks to the weight column permutation).
    pool_ref[...] = jnp.maximum(act[:, :half], act[:, half:])     # (H, (W/2)*Cout)
    # y direction: strided row-pair max from the small VMEM scratch.
    ypool = jnp.maximum(pool_ref[pl.ds(0, Ho, stride=2), :],
                        pool_ref[pl.ds(1, Ho, stride=2), :])      # (H/2, (W/2)*Cout)
    o_ref[0] = ypool.astype(o_ref.dtype)


def _pack_conv1_weight(w1_oihw, W):
    """(Cmid,Cin,3,3) -> banded (3*(W+2)*Cin, W*Cmid): row (ky, j, ci), col (x, cm)
    holds w1[ky,kx,ci,cm] where j = x + kx (x zero-padding folded in)."""
    Cmid, Cin, KH, KW = w1_oihw.shape
    w1 = jnp.transpose(w1_oihw, (2, 3, 1, 0)).astype(jnp.float32)   # (3,3,Cin,Cmid)
    Wp = W + 2
    blocks = []
    for ky in range(KH):
        blk = jnp.zeros((Wp, Cin, W, Cmid), jnp.float32)
        for kx in range(KW):
            P = np.zeros((Wp, W), np.float32)
            P[np.arange(W) + kx, np.arange(W)] = 1.0
            blk = blk + jnp.einsum("jx,cm->jcxm", jnp.asarray(P), w1[ky, kx])
        blocks.append(blk.reshape(Wp * Cin, W * Cmid))
    return jnp.concatenate(blocks, axis=0)                          # (3*(W+2)*Cin, W*Cmid)


def _pack_conv2_weight(w2_oihw, W):
    """(Cout,Cmid,3,3) -> (3, W*Cmid, W*Cout): block ky maps row (xin, ci) to col (x, co)
    with weight w2[ky,kx,ci,co], xin = x + kx - 1 (zeros outside [0,W) = x padding).
    Output columns are permuted to [x even | x odd] so the x-pool is a lane-half max."""
    Cout, Cmid, KH, KW = w2_oihw.shape
    w2 = jnp.transpose(w2_oihw, (2, 3, 1, 0)).astype(jnp.float32)   # (3,3,Cmid,Cout)
    co = np.arange(Cout)[None, :]
    perm = np.concatenate([
        (np.arange(0, W, 2)[:, None] * Cout + co).reshape(-1),
        (np.arange(1, W, 2)[:, None] * Cout + co).reshape(-1),
    ])
    blocks = []
    for ky in range(KH):
        blk = jnp.zeros((W, Cmid, W, Cout), jnp.float32)
        for kx in range(KW):
            xs = np.arange(W)
            xin = xs + kx - 1
            ok = (xin >= 0) & (xin < W)
            Q = np.zeros((W, W), np.float32)
            Q[xin[ok], xs[ok]] = 1.0
            blk = blk + jnp.einsum("ix,cm->icxm", jnp.asarray(Q), w2[ky, kx])
        blocks.append(blk.reshape(W * Cmid, W * Cout)[:, perm])
    return jnp.stack(blocks, axis=0)                                # (3, W*Cmid, W*Cout)


@jax.jit
def encoder_block_forward(x_nchw, w1_oihw, w2_oihw):
    """EncoderBlock.forward (eval): double conv 3x3 + ReLU, 2x2 max-pool, dropout=identity."""
    N, Cin, H, W = x_nchw.shape
    Cmid = w1_oihw.shape[0]
    Cout = w2_oihw.shape[0]
    assert H % 2 == 0 and W % 2 == 0, "2x2 max-pool needs even spatial dims"

    # ---- XLA-side layout glue (cheap, scheduled around the tiny custom call) ----
    x = jnp.transpose(x_nchw, (0, 2, 3, 1))                     # NHWC
    xp = jnp.pad(x, ((0, 0), (1, 1), (1, 1), (0, 0)))           # zero pad H, W by 1
    xrows = xp.reshape(N, H + 2, (W + 2) * Cin)                 # rows flattened lane-wise
    xcat = jnp.concatenate(                                     # conv1 im2row (3 ky windows)
        [xrows[:, 0:H], xrows[:, 1:H + 1], xrows[:, 2:H + 2]], axis=-1)

    w1p = _pack_conv1_weight(w1_oihw, W)                        # (3*(W+2)*Cin, W*Cmid)
    w2p = _pack_conv2_weight(w2_oihw, W)                        # (3, W*Cmid, W*Cout)

    K1 = 3 * (W + 2) * Cin
    Ho, Wo = H // 2, W // 2

    flops = 2 * N * H * W * 9 * (Cin * Cmid + Cmid * Cout)
    bytes_accessed = 4 * (N * H * K1 + K1 * W * Cmid
                          + 3 * W * Cmid * W * Cout + N * Ho * Wo * Cout)

    out = pl.pallas_call(
        encoder_block_kernel,
        out_shape=jax.ShapeDtypeStruct((N, Ho, Wo * Cout), x_nchw.dtype),
        grid_spec=pltpu.PrefetchScalarGridSpec(
            num_scalar_prefetch=0,
            grid=(N,),  # one image per step; "parallel" -> both TCs on v7x, 2 cheap steps on v5e/v6e
            in_specs=[
                pl.BlockSpec((1, H, K1), lambda n: (n, 0, 0)),
                pl.BlockSpec((K1, W * Cmid), lambda n: (0, 0)),            # resident weights
                pl.BlockSpec((3, W * Cmid, W * Cout), lambda n: (0, 0, 0)),
            ],
            out_specs=pl.BlockSpec((1, Ho, Wo * Cout), lambda n: (n, 0, 0)),
            scratch_shapes=[pltpu.VMEM((H, Wo * Cout), jnp.float32)],
        ),
        compiler_params=pltpu.CompilerParams(
            dimension_semantics=("parallel",)),
        cost_estimate=pl.CostEstimate(flops=flops, transcendentals=0,
                                      bytes_accessed=bytes_accessed),
    )(xcat, w1p, w2p)

    # (N, H/2, (W/2)*Cout) -> NCHW.  Dropout2d is identity in eval mode.
    # TODO(synk): training-mode Dropout2d (random channel masking + 1/(1-p) scale) not implemented.
    out = out.reshape(N, Ho, Wo, Cout)
    return jnp.transpose(out, (0, 3, 1, 2))


def _reference(x, w1, w2):
    dn = ("NCHW", "OIHW", "NCHW")
    y = jax.lax.conv_general_dilated(x, w1, (1, 1), [(1, 1), (1, 1)], dimension_numbers=dn)
    y = jnp.maximum(y, 0.0)
    y = jax.lax.conv_general_dilated(y, w2, (1, 1), [(1, 1), (1, 1)], dimension_numbers=dn)
    y = jnp.maximum(y, 0.0)
    y = jax.lax.reduce_window(y, -jnp.inf, jax.lax.max,
                              (1, 1, 2, 2), (1, 1, 2, 2), "VALID")
    return y


if __name__ == "__main__":
    # EncoderBlock(input_channels=4) -> output_channels = middle_channels = 8,
    # kernel 3x3, padding 1, no bias, maxpool 2x2, dropout (identity in eval).
    N, Cin, Cmid, Cout, H, W = 2, 4, 8, 8, 16, 16

    key = jax.random.PRNGKey(0)
    kx, k1, k2 = jax.random.split(key, 3)
    x = jax.random.normal(kx, (N, Cin, H, W), dtype=jnp.float32)
    w1 = 0.1 * jax.random.normal(k1, (Cmid, Cin, 3, 3), dtype=jnp.float32)  # OIHW
    w2 = 0.1 * jax.random.normal(k2, (Cout, Cmid, 3, 3), dtype=jnp.float32)  # OIHW

    out = jax.block_until_ready(encoder_block_forward(x, w1, w2))
    ref = jax.block_until_ready(_reference(x, w1, w2))

    assert out.shape == (N, Cout, H // 2, W // 2), out.shape
    assert jnp.allclose(out, ref, atol=2e-4, rtol=2e-4), \
        float(jnp.max(jnp.abs(out - ref)))

    print("KERNEL_OK")
</pallas_src>

<mosaic_0001>
module attributes {stable_mosaic.version = 11 : i64} {
  func.func @encoder_block_kernel(%arg0: i32, %arg1: memref<1x16x216xf32, #tpu.memory_space<vmem>>, %arg2: memref<216x128xf32, #tpu.memory_space<vmem>>, %arg3: memref<3x128x128xf32, #tpu.memory_space<vmem>>, %arg4: memref<1x8x64xf32, #tpu.memory_space<vmem>>, %arg5: memref<16x64xf32, #tpu.memory_space<vmem>>) attributes {dimension_semantics = [#tpu.dimension_semantics<parallel>], iteration_bounds = array<i64: 2>, scalar_prefetch = 0 : i64, scratch_operands = 1 : i64, tpu.core_type = #tpu.core_type<tc>, window_params = [{transform_indices = @transform_0, window_bounds = array<i64: 1, 16, 216>}, {pipeline_mode = #tpu.pipeline_mode<synchronous>, transform_indices = @transform_1, window_bounds = array<i64: 216, 128>}, {pipeline_mode = #tpu.pipeline_mode<synchronous>, transform_indices = @transform_2, window_bounds = array<i64: 3, 128, 128>}, {transform_indices = @transform_3, window_bounds = array<i64: 1, 8, 64>}]} {
    %c0 = arith.constant 0 : index
    %c0_0 = arith.constant 0 : index
    %c0_1 = arith.constant 0 : index
    %0 = vector.load %arg1[%c0, %c0_0, %c0_1] : memref<1x16x216xf32, #tpu.memory_space<vmem>>, vector<1x16x216xf32>
    %1 = vector.shape_cast %0 : vector<1x16x216xf32> to vector<16x216xf32>
    %c0_2 = arith.constant 0 : index
    %c0_3 = arith.constant 0 : index
    %2 = vector.load %arg2[%c0_2, %c0_3] : memref<216x128xf32, #tpu.memory_space<vmem>>, vector<216x128xf32>
    %cst = arith.constant dense<0.000000e+00> : vector<16x128xf32>
    %3 = tpu.matmul %1, %2, %cst {dimension_numbers = #tpu.dot_dimension_numbers<[1], [0], [0], [1], [0, 0, 1, 1], [], []>} : vector<16x216xf32>, vector<216x128xf32>, vector<16x128xf32> -> vector<16x128xf32>
    %cst_4 = arith.constant 0.000000e+00 : f32
    %4 = vector.broadcast %cst_4 : f32 to vector<16x128xf32>
    %5 = arith.maximumf %3, %4 : vector<16x128xf32>
    %cst_5 = arith.constant 0.000000e+00 : f32
    %6 = vector.broadcast %cst_5 : f32 to vector<1x128xf32>
    %7 = vector.extract_strided_slice %5 {offsets = [0, 0], sizes = [15, 128], strides = [1, 1]} : vector<16x128xf32> to vector<15x128xf32>
    %8 = tpu.concatenate %6, %7 in 0 : vector<1x128xf32>, vector<15x128xf32> -> vector<16x128xf32>
    %9 = vector.extract_strided_slice %5 {offsets = [1, 0], sizes = [15, 128], strides = [1, 1]} : vector<16x128xf32> to vector<15x128xf32>
    %10 = tpu.concatenate %9, %6 in 0 : vector<15x128xf32>, vector<1x128xf32> -> vector<16x128xf32>
    %c0_6 = arith.constant 0 : index
    %c0_7 = arith.constant 0 : index
    %c0_8 = arith.constant 0 : index
    %11 = vector.load %arg3[%c0_6, %c0_7, %c0_8] : memref<3x128x128xf32, #tpu.memory_space<vmem>>, vector<1x128x128xf32>
    %12 = vector.shape_cast %11 : vector<1x128x128xf32> to vector<128x128xf32>
    %cst_9 = arith.constant dense<0.000000e+00> : vector<16x128xf32>
    %13 = tpu.matmul %8, %12, %cst_9 {dimension_numbers = #tpu.dot_dimension_numbers<[1], [0], [0], [1], [0, 0, 1, 1], [], []>} : vector<16x128xf32>, vector<128x128xf32>, vector<16x128xf32> -> vector<16x128xf32>
    %c1 = arith.constant 1 : index
    %c0_10 = arith.constant 0 : index
    %c0_11 = arith.constant 0 : index
    %14 = vector.load %arg3[%c1, %c0_10, %c0_11] : memref<3x128x128xf32, #tpu.memory_space<vmem>>, vector<1x128x128xf32>
    %15 = vector.shape_cast %14 : vector<1x128x128xf32> to vector<128x128xf32>
    %cst_12 = arith.constant dense<0.000000e+00> : vector<16x128xf32>
    %16 = tpu.matmul %5, %15, %cst_12 {dimension_numbers = #tpu.dot_dimension_numbers<[1], [0], [0], [1], [0, 0, 1, 1], [], []>} : vector<16x128xf32>, vector<128x128xf32>, vector<16x128xf32> -> vector<16x128xf32>
    %17 = arith.addf %13, %16 : vector<16x128xf32>
    %c2 = arith.constant 2 : index
    %c0_13 = arith.constant 0 : index
    %c0_14 = arith.constant 0 : index
    %18 = vector.load %arg3[%c2, %c0_13, %c0_14] : memref<3x128x128xf32, #tpu.memory_space<vmem>>, vector<1x128x128xf32>
    %19 = vector.shape_cast %18 : vector<1x128x128xf32> to vector<128x128xf32>
    %cst_15 = arith.constant dense<0.000000e+00> : vector<16x128xf32>
    %20 = tpu.matmul %10, %19, %cst_15 {dimension_numbers = #tpu.dot_dimension_numbers<[1], [0], [0], [1], [0, 0, 1, 1], [], []>} : vector<16x128xf32>, vector<128x128xf32>, vector<16x128xf32> -> vector<16x128xf32>
    %21 = arith.addf %17, %20 : vector<16x128xf32>
    %cst_16 = arith.constant 0.000000e+00 : f32
    %22 = vector.broadcast %cst_16 : f32 to vector<16x128xf32>
    %23 = arith.maximumf %21, %22 : vector<16x128xf32>
    %24 = vector.extract_strided_slice %23 {offsets = [0, 0], sizes = [16, 64], strides = [1, 1]} : vector<16x128xf32> to vector<16x64xf32>
    %25 = vector.extract_strided_slice %23 {offsets = [0, 64], sizes = [16, 64], strides = [1, 1]} : vector<16x128xf32> to vector<16x64xf32>
    %26 = arith.maximumf %24, %25 : vector<16x64xf32>
    %c0_17 = arith.constant 0 : index
    %c0_18 = arith.constant 0 : index
    %27 = vector.load %arg5[%c0_17, %c0_18] : memref<16x64xf32, #tpu.memory_space<vmem>>, vector<16x64xf32>
    tpu.vector_store %arg5[%c0_17, %c0_18], %26 {strides = array<i32>} : memref<16x64xf32, #tpu.memory_space<vmem>>, vector<16x64xf32>,
    %c0_19 = arith.constant 0 : index
    %c0_20 = arith.constant 0 : index
    %28 = tpu.strided_load %arg5[%c0_19, %c0_20] {strides = array<i32: 2, 1>} : memref<16x64xf32, #tpu.memory_space<vmem>>, vector<8x64xf32>
    %c1_21 = arith.constant 1 : index
    %c0_22 = arith.constant 0 : index
    %29 = tpu.strided_load %arg5[%c1_21, %c0_22] {strides = array<i32: 2, 1>} : memref<16x64xf32, #tpu.memory_space<vmem>>, vector<8x64xf32>
    %30 = arith.maximumf %28, %29 : vector<8x64xf32>
    %c0_23 = arith.constant 0 : index
    %c0_24 = arith.constant 0 : index
    %c0_25 = arith.constant 0 : index
    %31 = vector.load %arg4[%c0_23, %c0_24, %c0_25] : memref<1x8x64xf32, #tpu.memory_space<vmem>>, vector<1x8x64xf32>
    %32 = vector.shape_cast %31 : vector<1x8x64xf32> to vector<8x64xf32>
    %33 = vector.shape_cast %30 : vector<8x64xf32> to vector<1x8x64xf32>
    tpu.vector_store %arg4[%c0_23, %c0_24, %c0_25], %33 {strides = array<i32>} : memref<1x8x64xf32, #tpu.memory_space<vmem>>, vector<1x8x64xf32>,
    return
  }
  func.func @transform_0(%arg0: i32) -> (i32, i32, i32) {
    %c0_i32 = arith.constant 0 : i32
    %c0_i32_0 = arith.constant 0 : i32
    %c0_i32_1 = arith.constant 0 : i32
    return %arg0, %c0_i32, %c0_i32_0 : i32, i32, i32
  }
  func.func @transform_1(%arg0: i32) -> (i32, i32) {
    %c0_i32 = arith.constant 0 : i32
    %c0_i32_0 = arith.constant 0 : i32
    %c0_i32_1 = arith.constant 0 : i32
    return %c0_i32, %c0_i32_0 : i32, i32
  }
  func.func @transform_2(%arg0: i32) -> (i32, i32, i32) {
    %c0_i32 = arith.constant 0 : i32
    %c0_i32_0 = arith.constant 0 : i32
    %c0_i32_1 = arith.constant 0 : i32
    %c0_i32_2 = arith.constant 0 : i32
    return %c0_i32, %c0_i32_0, %c0_i32_1 : i32, i32, i32
  }
  func.func @transform_3(%arg0: i32) -> (i32, i32, i32) {
    %c0_i32 = arith.constant 0 : i32
    %c0_i32_0 = arith.constant 0 : i32
    %c0_i32_1 = arith.constant 0 : i32
    return %arg0, %c0_i32, %c0_i32_0 : i32, i32, i32
  }
}

</mosaic_0001>

<bundles_post_ra>
// kernel: encoder_block_forward.1
= control target key start
LH: loop header
LB: loop body
LE: loop exit
PB: predicated region body
PF: predicated region fallthrough
CT: control target
= control target key end

     0   :  { %s897_s12 = smov 0   ;;  %s1185_s0 = inlined_call_operand.vmem [shape: f32[2,16,216], index: 0, kind: input, shape index: {}]   ;;  %s1186_s1 = inlined_call_operand.vmem [shape: f32[216,128], index: 1, kind: input, shape index: {}]   ;;  %s1187_s2 = inlined_call_operand.vmem [shape: f32[3,128,128], index: 2, kind: input, shape index: {}]   ;;  %s1188_s3 = inlined_call_operand.vmem [shape: f32[2,8,64], index: 3, kind: output, shape index: {}]  }
   0x1 LB: > { %s650_s13 = sadd.s32 4294967295, %s873_s12   ;;  %p654_p0 = scmp.ge.s32.totalorder %s873_s12, 1  ;;  %s873_s12 = sphi %s897_s12, %s13_s12  }
   0x2   : > { %p137_p1 = scmp.lt.s32.totalorder %s873_s12, 3 }
   0x4   : > { %p138_p2 = pnand %p654_p0, %p137_p1 }
   0x5   : > { %p160_p3 = scmp.lt.s32.totalorder (!%p138_p2), %s650_s13, 1 }
   0x6   : > { %141 = sbr.rel (%p138_p2) target bundleno = 630 (0x276), region = 32 }
   0xb   : > { %v188_v0 = vld [vmem:[%s1186_s1 + $0x78] sm:$0xff]  ;;  %v875_v1 = vmov 0.0   ;;  %v187_v2 = vld [vmem:[%s1186_s1 + $0x70] sm:$0xff]  ;;  %s1190_s13 = smov (!%p160_p3, %s650_s13), 1  ;;  %v186_v3 = vld [vmem:[%s1186_s1 + $0x68] sm:$0xff]  ;;  %vm200_vm0 = vcmask 719872  }
   0xc   : > { %207 = vmatprep.subr.mxu0 %v875_v1  ;;  %s697_s20 = sshll.u32 %s1190_s13, 5  ;;  %v185_v4 = vld [vmem:[%s1186_s1 + $0x60] sm:$0xff]  ;;  %v184_v5 = vld [vmem:[%s1186_s1 + $0x58] sm:$0xff]  ;;  %v183_v6 = vld [vmem:[%s1186_s1 + $0x50] sm:$0xff]  ;;  %vm286_vm1 = vcmask 1040384   ;;  %vm293_vm3 = vcmask 1046528  }
   0xd   : > { %208 = vmatpush1.msra.mxu0 %v188_v0  ;;  %s926_s25 = scalar_lea.vmem %s1185_s0, %s697_s20  ;;  %v675_v8 = vld [vmem:[%s1187_s2 + $0xf8] sm:$0xff]  ;;  %v674_v9 = vld [vmem:[%s1187_s2 + $0xf0] sm:$0xff]  ;;  %v182_v10 = vld [vmem:[%s1186_s1 + $0x48] sm:$0xff]  ;;  %s876_s20 = smov 64   ;;  %vm589_vm4 = vcmask 523264  }
   0xe   : > { %209 = vmatprep.subr.mxu0 %v875_v1  ;;  %v170_v7 = vld [vmem:[%s926_s25 + $0x8] sm:$0xff]  ;;  %752 = vmatprep.subr.mxu1 %v675_v8  ;;  %v181_v12 = vld [vmem:[%s1186_s1 + $0x40] sm:$0xff]  ;;  %v180_v14 = vld [vmem:[%s1186_s1 + $0x38] sm:$0xff]  ;;  %s657_s21 = sshll.u32 %s1190_s13, 3 }
   0xf   : > { %210 = vmatpush1.msra.mxu0 %v187_v2  ;;  %658 = vmatprep.mubr.msk.f32.mxu0 %vm200_vm0, %v170_v7  ;;  %v673_v11 = vld [vmem:[%s1187_s2 + $0xe8] sm:$0xff]  ;;  %v672_v13 = vld [vmem:[%s1187_s2 + $0xe0] sm:$0xff]  ;;  %v671_v15 = vld [vmem:[%s1187_s2 + $0xd8] sm:$0xff]  ;;  %s168_s24 = scalar_lea.vmem %s1188_s3, %s657_s21 }
  0x10   : > { %211 = vmatprep.subr.mxu0 %v875_v1  ;;  %753 = vmatpush3.msra.mxu1 %v675_v8  ;;  %v179_v16 = vld [vmem:[%s1186_s1 + $0x30] sm:$0xff]  ;;  %v178_v18 = vld [vmem:[%s1186_s1 + $0x28] sm:$0xff]  ;;  %v177_v20 = vld [vmem:[%s1186_s1 + $0x20] sm:$0xff] }
  0x11   : > { %212 = vmatpush1.msra.mxu0 %v186_v3  ;;  %754 = vmatprep.subr.mxu1 %v674_v9  ;;  %v670_v17 = vld [vmem:[%s1187_s2 + $0xd0] sm:$0xff]  ;;  %v669_v19 = vld [vmem:[%s1187_s2 + $0xc8] sm:$0xff]  ;;  %v668_v21 = vld [vmem:[%s1187_s2 + $0xc0] sm:$0xff] }
  0x12   : > { %213 = vmatprep.subr.mxu0 %v875_v1  ;;  %755 = vmatpush3.msra.mxu1 %v674_v9  ;;  %v176_v22 = vld [vmem:[%s1186_s1 + $0x18] sm:$0xff]  ;;  %v175_v24 = vld [vmem:[%s1186_s1 + $0x10] sm:$0xff]  ;;  %v174_v26 = vld [vmem:[%s1186_s1 + $0x8] sm:$0xff] }
  0x13   : > { %214 = vmatpush1.msra.mxu0 %v185_v4  ;;  %756 = vmatprep.subr.mxu1 %v673_v11  ;;  %v667_v23 = vld [vmem:[%s1187_s2 + $0xb8] sm:$0xff]  ;;  %v666_v25 = vld [vmem:[%s1187_s2 + $0xb0] sm:$0xff]  ;;  %v665_v27 = vld [vmem:[%s1187_s2 + $0xa8] sm:$0xff] }
  0x14   : > { %215 = vmatprep.subr.mxu0 %v875_v1  ;;  %757 = vmatpush3.msra.mxu1 %v673_v11  ;;  %v173_v28 = vld [vmem:[%s1186_s1] sm:$0xff]  ;;  %v199_v30 = vld [vmem:[%s1186_s1 + $0xd0] sm:$0xff]  ;;  %v663_v31 = vld [vmem:[%s1187_s2 + $0x98] sm:$0xff] }
  0x15   : > { %216 = vmatpush1.msra.mxu0 %v184_v5  ;;  %758 = vmatprep.subr.mxu1 %v672_v13  ;;  %v664_v29 = vld [vmem:[%s1187_s2 + $0xa0] sm:$0xff]  ;;  %v198_v32 = vld [vmem:[%s1186_s1 + $0xc8] sm:$0xff]  ;;  %v196_v34 = vld [vmem:[%s1186_s1 + $0xb8] sm:$0xff] }
  0x16   : > { %217 = vmatprep.subr.mxu0 %v875_v1  ;;  %759 = vmatpush3.msra.mxu1 %v672_v13  ;;  %v197_v33 = vld [vmem:[%s1186_s1 + $0xc0] sm:$0xff]  ;;  %v195_v35 = vld [vmem:[%s1186_s1 + $0xb0] sm:$0xff]  ;;  %v194_v36 = vld [vmem:[%s1186_s1 + $0xa8] sm:$0xff] }
  0x17   : > { %218 = vmatpush1.msra.mxu0 %v183_v6  ;;  %760 = vmatprep.subr.mxu1 %v671_v15  ;;  %v193_v37 = vld [vmem:[%s1186_s1 + $0xa0] sm:$0xff]  ;;  %v192_v38 = vld [vmem:[%s1186_s1 + $0x98] sm:$0xff]  ;;  %v191_v39 = vld [vmem:[%s1186_s1 + $0x90] sm:$0xff] }
  0x18   : > { %219 = vmatprep.subr.mxu0 %v875_v1  ;;  %761 = vmatpush3.msra.mxu1 %v671_v15  ;;  %v190_v40 = vld [vmem:[%s1186_s1 + $0x88] sm:$0xff]  ;;  %v189_v41 = vld [vmem:[%s1186_s1 + $0x80] sm:$0xff]  ;;  %v693_v43 = vld [vmem:[%s1187_s2 + $0x178] sm:$0xff] }
  0x19   : > { %220 = vmatpush1.msra.mxu0 %v182_v10  ;;  %762 = vmatprep.subr.mxu1 %v670_v17  ;;  %v169_v42 = vld [vmem:[%s926_s25] sm:$0xff]  ;;  %v172_v44 = vld [vmem:[%s926_s25 + $0x18] sm:$0xff]  ;;  %v692_v45 = vld [vmem:[%s1187_s2 + $0x170] sm:$0xff] }
  0x1a   : > { %221 = vmatprep.subr.mxu0 %v875_v1  ;;  %763 = vmatpush3.msra.mxu1 %v670_v17  ;;  %v171_v46 = vld [vmem:[%s926_s25 + $0x10] sm:$0xff]  ;;  %v691_v47 = vld [vmem:[%s1187_s2 + $0x168] sm:$0xff]  ;;  %v690_v48 = vld [vmem:[%s1187_s2 + $0x160] sm:$0xff] }
  0x1b   : > { %222 = vmatpush1.msra.mxu0 %v181_v12  ;;  %764 = vmatprep.subr.mxu1 %v669_v19  ;;  %v689_v49 = vld [vmem:[%s1187_s2 + $0x158] sm:$0xff]  ;;  %v688_v50 = vld [vmem:[%s1187_s2 + $0x150] sm:$0xff]  ;;  %v687_v51 = vld [vmem:[%s1187_s2 + $0x148] sm:$0xff] }
  0x1c   : > { %223 = vmatprep.subr.mxu0 %v875_v1  ;;  %765 = vmatpush3.msra.mxu1 %v669_v19  ;;  %v686_v52 = vld [vmem:[%s1187_s2 + $0x140] sm:$0xff]  ;;  %v685_v53 = vld [vmem:[%s1187_s2 + $0x138] sm:$0xff]  ;;  %v684_v54 = vld [vmem:[%s1187_s2 + $0x130] sm:$0xff] }
  0x1d   : > { %224 = vmatpush1.msra.mxu0 %v180_v14  ;;  %766 = vmatprep.subr.mxu1 %v668_v21  ;;  %v683_v55 = vld [vmem:[%s1187_s2 + $0x128] sm:$0xff]  ;;  %v662_v56 = vld [vmem:[%s1187_s2 + $0x90] sm:$0xff]  ;;  %v682_v57 = vld [vmem:[%s1187_s2 + $0x120] sm:$0xff] }
  0x1e   : > { %225 = vmatprep.subr.mxu0 %v875_v1  ;;  %767 = vmatpush3.msra.mxu1 %v668_v21  ;;  %v661_v58 = vld [vmem:[%s1187_s2 + $0x88] sm:$0xff]  ;;  %v681_v59 = vld [vmem:[%s1187_s2 + $0x118] sm:$0xff]  ;;  %v660_v60 = vld [vmem:[%s1187_s2 + $0x80] sm:$0xff] }
  0x1f   : > { %226 = vmatpush1.msra.mxu0 %v179_v16  ;;  %768 = vmatprep.subr.mxu1 %v667_v23  ;;  %v680_v61 = vld [vmem:[%s1187_s2 + $0x110] sm:$0xff]  ;;  %v315_v62 = vld [vmem:[%s1187_s2 + $0x78] sm:$0xff]  ;;  %v679_v63 = vld [vmem:[%s1187_s2 + $0x108] sm:$0xff] }
  0x20   : > { %227 = vmatprep.subr.mxu0 %v875_v1  ;;  %769 = vmatpush3.msra.mxu1 %v667_v23  ;;  %v678_v0 = vld [vmem:[%s1187_s2 + $0x100] sm:$0xff]  ;;  %vm676_vm2 = vmneg %vm286_vm1  ;;  %v314_v8 = vld [vmem:[%s1187_s2 + $0x70] sm:$0xff] }
  0x21   : > { %228 = vmatpush1.msra.mxu0 %v178_v18  ;;  %770 = vmatprep.subr.mxu1 %v666_v25  ;;  %v313_v11 = vld [vmem:[%s1187_s2 + $0x68] sm:$0xff]  ;;  %v312_v13 = vld [vmem:[%s1187_s2 + $0x60] sm:$0xff]  ;;  %v311_v14 = vld [vmem:[%s1187_s2 + $0x58] sm:$0xff] }
  0x22   : > { %229 = vmatprep.subr.mxu0 %v875_v1  ;;  %771 = vmatpush3.msra.mxu1 %v666_v25  ;;  %v310_v15 = vld [vmem:[%s1187_s2 + $0x50] sm:$0xff]  ;;  %v309_v16 = vld [vmem:[%s1187_s2 + $0x48] sm:$0xff]  ;;  %v308_v17 = vld [vmem:[%s1187_s2 + $0x40] sm:$0xff] }
  0x23   : > { %230 = vmatpush1.msra.mxu0 %v177_v20  ;;  %772 = vmatprep.subr.mxu1 %v665_v27  ;;  %v307_v18 = vld [vmem:[%s1187_s2 + $0x38] sm:$0xff]  ;;  %v306_v19 = vld [vmem:[%s1187_s2 + $0x30] sm:$0xff]  ;;  %v305_v20 = vld [vmem:[%s1187_s2 + $0x28] sm:$0xff] }
  0x24   : > { %231 = vmatprep.subr.mxu0 %v875_v1  ;;  %773 = vmatpush3.msra.mxu1 %v665_v27  ;;  %v304_v21 = vld [vmem:[%s1187_s2 + $0x20] sm:$0xff]  ;;  %v302_v23 = vld [vmem:[%s1187_s2 + $0x10] sm:$0xff] }
  0x25   : > { %232 = vmatpush1.msra.mxu0 %v176_v22  ;;  %774 = vmatprep.subr.mxu1 %v664_v29  ;;  %v303_v22 = vld [vmem:[%s1187_s2 + $0x18] sm:$0xff] }
  0x26   : > { %233 = vmatprep.subr.mxu0 %v875_v1  ;;  %775 = vmatpush3.msra.mxu1 %v664_v29 }
  0x27   : > { %234 = vmatpush1.msra.mxu0 %v175_v24  ;;  %776 = vmatprep.subr.mxu1 %v663_v31  ;;  %v301_v24 = vld [vmem:[%s1187_s2 + $0x8] sm:$0xff] }
  0x28   : > { %235 = vmatprep.subr.mxu0 %v875_v1  ;;  %777 = vmatpush3.msra.mxu1 %v663_v31 }
  0x29   : > { %236 = vmatpush1.msra.mxu0 %v174_v26  ;;  %778 = vmatprep.subr.mxu1 %v662_v56  ;;  %v300_v26 = vld [vmem:[%s1187_s2] sm:$0xff] }
  0x2a   : > { %237 = vmatprep.subr.mxu0 %v875_v1  ;;  %779 = vmatpush3.msra.mxu1 %v662_v56 }
  0x2b   : > { %238 = vmatpush1.msra.mxu0 %v173_v28  ;;  %780 = vmatprep.subr.mxu1 %v661_v58 }
  0x2c   : > { %249 = vmatprep.subr.mxu0 %v875_v1  ;;  %781 = vmatpush3.msra.mxu1 %v661_v58 }
  0x2d   : > { %250 = vmatpush2.msra.mxu0 %v199_v30  ;;  %782 = vmatprep.subr.mxu1 %v660_v60 }
  0x2e   : > { %251 = vmatprep.subr.mxu0 %v875_v1  ;;  %783 = vmatpush3.msra.mxu1 %v660_v60 }
  0x2f   : > { %252 = vmatpush2.msra.mxu0 %v198_v32  ;;  %787 = vmatprep.subr.mxu1 %v315_v62 }
  0x30   : > { %253 = vmatprep.subr.mxu0 %v875_v1 }
  0x31   : > { %254 = vmatpush2.msra.mxu0 %v197_v33 }
  0x32   : > { %255 = vmatprep.subr.mxu0 %v875_v1 }
  0x33   : > { %256 = vmatpush2.msra.mxu0 %v196_v34 }
  0x34   : > { %257 = vmatprep.subr.mxu0 %v875_v1 }
  0x35   : > { %258 = vmatpush2.msra.mxu0 %v195_v35 }
  0x36   : > { %259 = vmatprep.subr.mxu0 %v875_v1 }
  0x37   : > { %260 = vmatpush2.msra.mxu0 %v194_v36 }
  0x38   : > { %261 = vmatprep.subr.mxu0 %v875_v1 }
  0x39   : > { %262 = vmatpush2.msra.mxu0 %v193_v37 }
  0x3a   : > { %263 = vmatprep.subr.mxu0 %v875_v1 }
  0x3b   : > { %264 = vmatpush2.msra.mxu0 %v192_v38 }
  0x3c   : > { %265 = vmatprep.subr.mxu0 %v875_v1 }
  0x3d   : > { %266 = vmatpush2.msra.mxu0 %v191_v39 }
  0x3e   : > { %267 = vmatprep.subr.mxu0 %v875_v1 }
  0x3f   : > { %268 = vmatpush2.msra.mxu0 %v190_v40 }
  0x40   : > { %269 = vmatprep.subr.mxu0 %v875_v1 }
  0x41   : > { %270 = vmatpush2.msra.mxu0 %v189_v41 }
  0x42   : > { %272 = vmatmul.mubr.f32.vlgmr.msra.gmra.mxu0 %v169_v42  ;;  %822 = vmatprep.subr.mxu0 %v693_v43 }
  0x43   : > { %659 = vmatprep.mubr.msk.f32.mxu0 %vm200_vm0, %v172_v44  ;;  %823 = vmatpush3.msra.mxu0 %v693_v43 }
  0x44   : > { %824 = vmatprep.subr.mxu0 %v692_v45 }
  0x45   : > { %825 = vmatpush3.msra.mxu0 %v692_v45 }
  0x46   : > { %277 = vmatmul.mubr.f32.gmra.mxu0 %v171_v46  ;;  %826 = vmatprep.subr.mxu0 %v691_v47 }
  0x47   : > { %827 = vmatpush3.msra.mxu0 %v691_v47 }
  0x48   : > { %828 = vmatprep.subr.mxu0 %v690_v48 }
  0x49   : > { %829 = vmatpush3.msra.mxu0 %v690_v48 }
  0x4a   : > { %830 = vmatprep.subr.mxu0 %v689_v49 }
  0x4b   : > { %831 = vmatpush3.msra.mxu0 %v689_v49 }
  0x4c   : > { %832 = vmatprep.subr.mxu0 %v688_v50 }
  0x4d   : > { %833 = vmatpush3.msra.mxu0 %v688_v50 }
  0x4e   : > { %834 = vmatprep.subr.mxu0 %v687_v51 }
  0x4f   : > { %835 = vmatpush3.msra.mxu0 %v687_v51 }
  0x50   : > { %836 = vmatprep.subr.mxu0 %v686_v52 }
  0x51   : > { %837 = vmatpush3.msra.mxu0 %v686_v52 }
  0x52   : > { %838 = vmatprep.subr.mxu0 %v685_v53 }
  0x53   : > { %839 = vmatpush3.msra.mxu0 %v685_v53 }
  0x54   : > { %840 = vmatprep.subr.mxu0 %v684_v54 }
  0x55   : > { %841 = vmatpush3.msra.mxu0 %v684_v54 }
  0x56   : > { %842 = vmatprep.subr.mxu0 %v683_v55 }
  0x57   : > { %843 = vmatpush3.msra.mxu0 %v683_v55 }
  0x58   : > { %844 = vmatprep.subr.mxu0 %v682_v57 }
  0x59   : > { %845 = vmatpush3.msra.mxu0 %v682_v57 }
  0x5a   : > { %846 = vmatprep.subr.mxu0 %v681_v59 }
  0x5b   : > { %847 = vmatpush3.msra.mxu0 %v681_v59 }
  0x5c   : > { %848 = vmatprep.subr.mxu0 %v680_v61 }
  0x5d   : > { %849 = vmatpush3.msra.mxu0 %v680_v61 }
  0x5e   : > { %850 = vmatprep.subr.mxu0 %v679_v63 }
  0x5f   : > { %851 = vmatpush3.msra.mxu0 %v679_v63 }
  0x60   : > { %852 = vmatprep.subr.mxu0 %v678_v0 }
  0x61   : > { %853 = vmatpush3.msra.mxu0 %v678_v0 }
 0x102   : > { %v273_v1 = vpop.f32.mrf.mxu0 }
 0x103   : > { %v1126_v2 = vmax.f32 %v273_v1, 0.0 }
 0x104   : > { %v275_v3 = vpop.f32.mrf.mxu0 }
 0x105   : > { %784 = vmatprep.mubr.f32.mxu1 %v1126_v2  ;;  %v287_v6 = vrot.slane %v1126_v2, 7  ;;  %v294_v9 = vrot.slane %v1126_v2, 1 }
 0x106   : > { %v278_v4 = vpop.f32.mrf.mxu0 }
 0x107   : > { %v283_v5 = vmax.f32 %v278_v4, 0.0 }
 0x108   : > { %v280_v7 = vpop.f32.mrf.mxu0 }
 0x109   : > { %v295_v10 = vrot.slane %v283_v5, 1  ;;  %785 = vmatmul.mubr.f32.vlgmr.msra.gmra.mxu1 %v283_v5  ;;  %v288_v25 = vrot.slane %v283_v5, 7 }
 0x10a   : > { %788 = vmatpush3.msra.mxu1 %v315_v62  ;;  %819 = vmatprep.mubr.msk.f32.mxu1 %vm676_vm2, %v287_v6 }
 0x10b   : > { %789 = vmatprep.subr.mxu1 %v314_v8  ;;  %v296_v12 = vsel %vm293_vm3, %v294_v9, %v295_v10  ;;  %v289_v27 = vsel %vm286_vm1, %v287_v6, %v288_v25 }
 0x10c   : > { %790 = vmatpush3.msra.mxu1 %v314_v8  ;;  %854 = vmatprep.mubr.f32.mxu0 %v296_v12 }
 0x10d   : > { %791 = vmatprep.subr.mxu1 %v313_v11  ;;  %855 = vmatmul.mubr.msk.f32.vlgmr.msra.gmra.mxu0 %vm293_vm3, %v295_v10 }
 0x10e   : > { %792 = vmatpush3.msra.mxu1 %v313_v11 }
 0x10f   : > { %793 = vmatprep.subr.mxu1 %v312_v13 }
 0x110   : > { %794 = vmatpush3.msra.mxu1 %v312_v13 }
 0x111   : > { %795 = vmatprep.subr.mxu1 %v311_v14 }
 0x112   : > { %796 = vmatpush3.msra.mxu1 %v311_v14 }
 0x113   : > { %797 = vmatprep.subr.mxu1 %v310_v15 }
 0x114   : > { %798 = vmatpush3.msra.mxu1 %v310_v15 }
 0x115   : > { %799 = vmatprep.subr.mxu1 %v309_v16 }
 0x116   : > { %800 = vmatpush3.msra.mxu1 %v309_v16 }
 0x117   : > { %801 = vmatprep.subr.mxu1 %v308_v17 }
 0x118   : > { %802 = vmatpush3.msra.mxu1 %v308_v17 }
 0x119   : > { %803 = vmatprep.subr.mxu1 %v307_v18 }
 0x11a   : > { %804 = vmatpush3.msra.mxu1 %v307_v18 }
 0x11b   : > { %805 = vmatprep.subr.mxu1 %v306_v19 }
 0x11c   : > { %806 = vmatpush3.msra.mxu1 %v306_v19 }
 0x11d   : > { %807 = vmatprep.subr.mxu1 %v305_v20 }
 0x11e   : > { %808 = vmatpush3.msra.mxu1 %v305_v20 }
 0x11f   : > { %809 = vmatprep.subr.mxu1 %v304_v21 }
 0x120   : > { %810 = vmatpush3.msra.mxu1 %v304_v21 }
 0x121   : > { %811 = vmatprep.subr.mxu1 %v303_v22 }
 0x122   : > { %812 = vmatpush3.msra.mxu1 %v303_v22 }
 0x123   : > { %813 = vmatprep.subr.mxu1 %v302_v23 }
 0x124   : > { %814 = vmatpush3.msra.mxu1 %v302_v23 }
 0x125   : > { %815 = vmatprep.subr.mxu1 %v301_v24 }
 0x126   : > { %816 = vmatpush3.msra.mxu1 %v301_v24 }
 0x127   : > { %817 = vmatprep.subr.mxu1 %v300_v26 }
 0x128   : > { %818 = vmatpush3.msra.mxu1 %v300_v26 }
 0x129   : > { %820 = vmatmul.mubr.f32.vlgmr.msra.gmra.mxu1 %v289_v27 }
 0x1c9   : > { %v786_v28 = vpop.f32.mrf.mxu1 }
 0x1cb   : > { %v399_v29 = vpop.f32.mrf.mxu1 }
 0x1cd   : > { %v856_v30 = vpop.f32.mrf.mxu0 }
 0x1cf   : > { %v566_v35 = vpop.f32.mrf.mxu0 }
 0x1e9   : > { %v821_v31 = vpop.f32.mrf.mxu1 }
 0x1ea   : > { %v480_v33 = vadd.f32 %v821_v31, %v786_v28 }
 0x1eb   : > { %v474_v32 = vpop.f32.mrf.mxu1 }
 0x1ec   : > { %v475_v34 = vadd.f32 %v474_v32, %v399_v29  ;;  %v576_v37 = vadd.f32 %v856_v30, %v480_v33 }
 0x1ee   : > { %v575_v36 = vadd.f32 %v566_v35, %v475_v34  ;;  %v578_v39 = vmax.f32 %v576_v37, 0.0 }
 0x1f0   : > { %v577_v38 = vmax.f32 %v575_v36, 0.0 }
 0x1f2   : > { %581 = vrot.lane.b32.xlu0 %v577_v38, %s876_s20 }
 0x1f6   : > { %583 = vrot.lane.b32.xlu0 %v578_v39, %s876_s20 }
 0x264   : > { %v582_v40 = vpop.permute.xlu0 %581 }
 0x265   : > { %v587_v41 = vmax.f32 %v577_v38, %v582_v40 }
 0x267   : > { %590 = vst.msk [vmem:[#allocation2] sm:$0xff] %vm589_vm4, %v587_v41 }
 0x268   : > { %v584_v42 = vpop.permute.xlu0 %583 }
 0x269   : > { %v588_v43 = vmax.f32 %v578_v39, %v584_v42 }
 0x26b   : > { %591 = vst.msk [vmem:[#allocation2 + $0x8] sm:$0xff] %vm589_vm4, %v588_v43 }
 0x272   : > { %v592_v44 = vld [vmem:[#allocation2] ss:$2 sm:$0xff]  ;;  %v594_v45 = vld [vmem:[#allocation2 + $0x1] ss:$2 sm:$0xff] }
 0x273   : > { %v595_v46 = vmax.f32 %v592_v44, %v594_v45 }
 0x275   : > { %596 = vst.msk [vmem:[%s168_s24] sm:$0xff] %vm589_vm4, %v595_v46 }
 0x276 PF: > { %s13_s12 = sadd.s32 1, %s873_s12  }
 0x277   : > { %p10_p4 = scmp.ge.s32.totalorder %s13_s12, 4  }
 0x279   :  { %12 = sbr.rel (!%p10_p4) target bundleno = 1 (0x1), region = 65 }

</bundles_post_ra>
